<compile_context>
chip_gen: v6e
topology: v6e:2x2x1
jax: 0.10.0
libtpu: 0.0.40
codegen_flags: <defaults>
</compile_context>

<pallas_src>
import functools

import jax
import jax.numpy as jnp
from jax import lax
from jax.experimental import pallas as pl
from jax.experimental.pallas import tpu as pltpu

LN_EPS = 1e-5
_MIB = 1024 * 1024


def _round_up(a: int, m: int) -> int:
    return (a + m - 1) // m * m


def _cdiv(a: int, b: int) -> int:
    return (a + b - 1) // b


def _vmem_budget_bytes() -> int:
    """Per-TensorCore VMEM budget with headroom for compiler scratch.
    v5e/v6e (128 MiB) -> 96 MiB; v7x (64 MiB) -> 48 MiB."""
    try:
        cap = int(pltpu.get_tpu_info().vmem_capacity_bytes)
    except Exception:
        cap = 64 * _MIB  # conservative (v7x-sized) fallback
    return (cap * 3) // 4


def _pick_tb(batch: int, sublane: int, target: int, min_tiles: int) -> int:
    """Row tile: split B as evenly as possible into ~target-sized tiles."""
    n_tiles = max(min_tiles, _cdiv(batch, target))
    return _round_up(_cdiv(batch, n_tiles), sublane)


# ---------------------------------------------------------------------------
# Kernels
# ---------------------------------------------------------------------------

def _lnact_epilogue(y_f32, params_f32, cout_true, out_dtype):
    """bias add + LayerNorm (true Cout) + SiLU, on a (tb, cout_p) f32 tile.

    Padded Cout lanes of y/bias are exact zeros (zero-padded W & bias), so the
    plain sums already equal the true-Cout sums; gamma/beta padded lanes are
    zero so padded outputs are exactly zero (sliced off outside)."""
    bias = params_f32[0:1, :]
    gamma = params_f32[1:2, :]
    beta = params_f32[2:3, :]

    y = y_f32 + bias
    inv_n = 1.0 / float(cout_true)
    mean = jnp.sum(y, axis=-1, keepdims=True) * inv_n
    var = jnp.sum(y * y, axis=-1, keepdims=True) * inv_n - mean * mean
    y_hat = (y - mean) * lax.rsqrt(var + LN_EPS)
    y_ln = y_hat * gamma + beta
    out = y_ln * jax.nn.sigmoid(y_ln)          # SiLU (EUP)
    # Dropout(p=0) is Identity.
    return out.astype(out_dtype)


def lnact_kernel_resident(x_ref, w_ref, p_ref, o_ref, *, cout_true: int):
    """Weight fully VMEM-resident; one MXU dot per row tile, fused epilogue."""
    y = jnp.dot(x_ref[...], w_ref[...], preferred_element_type=jnp.float32)
    o_ref[...] = _lnact_epilogue(y, p_ref[...].astype(jnp.float32),
                                 cout_true, o_ref.dtype)


def lnact_kernel_streamk(x_ref, w_ref, p_ref, o_ref, acc_ref, *, cout_true: int):
    """K-streamed matmul with resident f32 accumulator; epilogue on last K."""
    k = pl.program_id(1)

    @pl.when(k == 0)
    def _():
        acc_ref[...] = jnp.zeros_like(acc_ref)

    acc_ref[...] += jnp.dot(x_ref[...], w_ref[...],
                            preferred_element_type=jnp.float32)

    @pl.when(k == pl.num_programs(1) - 1)
    def _():
        o_ref[...] = _lnact_epilogue(acc_ref[...],
                                     p_ref[...].astype(jnp.float32),
                                     cout_true, o_ref.dtype)


# ---------------------------------------------------------------------------
# Host-side wrapper
# ---------------------------------------------------------------------------

def make_lnact(weight_t, bias, gamma, beta, out_dtype=None, force_streaming=False):
    """Build the fused LNAct forward.  Static params are padded ONCE here
    (out of the hot path).  weight_t: (Cin, Cout); bias/gamma/beta: (1, Cout)."""
    Cin, Cout = weight_t.shape
    cout_p = _round_up(Cout, 128)
    w_item = jnp.dtype(weight_t.dtype).itemsize
    budget = _vmem_budget_bytes()

    # Merge bias/gamma/beta into a single (3, cout_p) array (one DMA/spec).
    params = jnp.concatenate(
        [jnp.reshape(bias, (1, Cout)),
         jnp.reshape(gamma, (1, Cout)),
         jnp.reshape(beta, (1, Cout))], axis=0)
    params = jnp.pad(params, ((0, 0), (0, cout_p - Cout)))
    param_bytes = 2 * 3 * cout_p * params.dtype.itemsize

    cin_res = _round_up(Cin, 128)
    w_bytes_res = cin_res * cout_p * w_item
    resident = (not force_streaming) and (2 * w_bytes_res + param_bytes <= budget // 2)

    if resident:
        cin_p, tk = cin_res, None
        w_p = jnp.pad(weight_t, ((0, cin_p - Cin), (0, cout_p - Cout)))
    else:
        tk_cap = _round_up(Cin, 128)
        tk = 128
        for cand in (1024, 512, 256):          # grow tk when VMEM allows
            if cand <= tk_cap and 2 * cand * cout_p * w_item <= budget // 2:
                tk = cand
                break
        tk = min(tk, tk_cap)
        cin_p = _round_up(Cin, tk)
        w_p = jnp.pad(weight_t, ((0, cin_p - Cin), (0, cout_p - Cout)))

    plan = dict(Cin=Cin, Cout=Cout, cout_p=cout_p, cin_p=cin_p, tk=tk,
                resident=resident, budget=budget, w_p=w_p, params=params,
                out_dtype=out_dtype)

    def forward(x):
        return _lnact_forward(x, plan)

    return forward


def _lnact_forward(x, plan):
    B, Cin = x.shape
    assert Cin == plan["Cin"]
    Cout, cout_p, cin_p = plan["Cout"], plan["cout_p"], plan["cin_p"]
    w_p, params, budget = plan["w_p"], plan["params"], plan["budget"]
    out_dtype = plan["out_dtype"] or x.dtype

    x_item = jnp.dtype(x.dtype).itemsize
    o_item = jnp.dtype(out_dtype).itemsize
    w_item = jnp.dtype(w_p.dtype).itemsize
    p_item = jnp.dtype(params.dtype).itemsize
    # Sublane packing: 8 rows for 32-bit, 16 for 16-bit, 32 for 8-bit dtypes.
    sublane = max(8 * (4 // x_item), 8 * (4 // o_item))

    if plan["resident"]:
        # >= 2 row tiles when B allows so the "parallel" row axis can shard
        # across v7x's two TensorCores (harmless extra step on 1-TC parts).
        min_tiles = 2 if B >= 2 * sublane else 1
        tb = _pick_tb(B, sublane, 512, min_tiles)

        fixed = 2 * cin_p * cout_p * w_item + 2 * 3 * cout_p * p_item

        def tile_bytes(t):
            return (2 * t * cin_p * x_item      # x tiles (double-buffered)
                    + 2 * t * cout_p * o_item   # out tiles
                    + t * cout_p * 4)           # f32 intermediate headroom

        while tb > sublane and fixed + tile_bytes(tb) > budget:
            tb = _round_up(tb // 2, sublane)

        b_p = _round_up(B, tb)
        if b_p != B or cin_p != Cin:
            x_p = jnp.pad(x, ((0, b_p - B), (0, cin_p - Cin)))
        else:
            x_p = x

        est = fixed + tile_bytes(tb)
        vmem_limit = int(min(budget, max(2 * est, 32 * _MIB)))

        out = pl.pallas_call(
            functools.partial(lnact_kernel_resident, cout_true=Cout),
            out_shape=jax.ShapeDtypeStruct((b_p, cout_p), out_dtype),
            grid_spec=pltpu.PrefetchScalarGridSpec(
                num_scalar_prefetch=0,
                grid=(b_p // tb,),
                in_specs=[
                    pl.BlockSpec((tb, cin_p), lambda i: (i, 0)),        # x
                    pl.BlockSpec((cin_p, cout_p), lambda i: (0, 0)),    # W (resident)
                    pl.BlockSpec((3, cout_p), lambda i: (0, 0)),        # bias/gamma/beta
                ],
                out_specs=pl.BlockSpec((tb, cout_p), lambda i: (i, 0)),
            ),
            compiler_params=pltpu.CompilerParams(
                dimension_semantics=("parallel",),
                vmem_limit_bytes=vmem_limit,
            ),
        )(x_p, w_p, params)

    else:
        tk = plan["tk"]
        nk = cin_p // tk
        tb = _pick_tb(B, sublane, 512, 1)

        fixed = 2 * tk * cout_p * w_item + 2 * 3 * cout_p * p_item

        def tile_bytes(t):
            return (2 * t * tk * x_item
                    + 2 * t * cout_p * o_item
                    + t * cout_p * 4)           # f32 accumulator scratch

        while tb > sublane and fixed + tile_bytes(tb) > budget:
            tb = _round_up(tb // 2, sublane)

        b_p = _round_up(B, tb)
        if b_p != B or cin_p != Cin:
            x_p = jnp.pad(x, ((0, b_p - B), (0, cin_p - Cin)))
        else:
            x_p = x

        est = fixed + tile_bytes(tb)
        vmem_limit = int(min(budget, max(2 * est, 32 * _MIB)))

        # Serpentine K: unchanged weight block index at row-tile boundaries
        # (skips one (tk, cout_p) weight re-fetch per row tile).  x follows
        # the same K order so the products match; f32 accumulation order only.
        def serp_k(i, k):
            return k + (nk - 1 - 2 * k) * (i % 2)

        out = pl.pallas_call(
            functools.partial(lnact_kernel_streamk, cout_true=Cout),
            out_shape=jax.ShapeDtypeStruct((b_p, cout_p), out_dtype),
            grid_spec=pltpu.PrefetchScalarGridSpec(
                num_scalar_prefetch=0,
                grid=(b_p // tb, nk),
                in_specs=[
                    pl.BlockSpec((tb, tk), lambda i, k: (i, serp_k(i, k))),      # x
                    pl.BlockSpec((tk, cout_p), lambda i, k: (serp_k(i, k), 0)),  # W
                    pl.BlockSpec((3, cout_p), lambda i, k: (0, 0)),              # params
                ],
                out_specs=pl.BlockSpec((tb, cout_p), lambda i, k: (i, 0)),
                scratch_shapes=[pltpu.VMEM((tb, cout_p), jnp.float32)],
            ),
            compiler_params=pltpu.CompilerParams(
                dimension_semantics=("parallel", "arbitrary"),
                vmem_limit_bytes=vmem_limit,
            ),
        )(x_p, w_p, params)

    if b_p != B or cout_p != Cout:
        out = out[:B, :Cout]
    return out


# ---------------------------------------------------------------------------
# Params / reference / test
# ---------------------------------------------------------------------------

def init_params(key, in_channels, out_channels):
    """Mirror LNAct.init_weights for activation=silu:
    kaiming_normal_(nonlinearity='relu') => std = sqrt(2 / fan_in)."""
    kw, kb = jax.random.split(key)
    std = (2.0 / in_channels) ** 0.5
    # PyTorch weight is (out, in); store transposed (in, out) for the kernel.
    weight_t = std * jax.random.normal(kw, (in_channels, out_channels), jnp.float32)
    bound = 1.0 / (in_channels ** 0.5)
    bias = jax.random.uniform(kb, (1, out_channels), jnp.float32, -bound, bound)
    gamma = jnp.ones((1, out_channels), jnp.float32)   # LayerNorm weight
    beta = jnp.zeros((1, out_channels), jnp.float32)   # LayerNorm bias
    return weight_t, bias, gamma, beta


def reference_forward(x, weight_t, bias, gamma, beta):
    y = x @ weight_t + bias
    mean = y.mean(-1, keepdims=True)
    var = ((y - mean) ** 2).mean(-1, keepdims=True)
    y = (y - mean) / jnp.sqrt(var + LN_EPS) * gamma + beta
    return y * jax.nn.sigmoid(y)


if __name__ == "__main__":
    in_channels, out_channels = 32, 64
    key = jax.random.PRNGKey(0)
    kx, kp = jax.random.split(key)

    weight_t, bias, gamma, beta = init_params(kp, in_channels, out_channels)

    # Resident-weight path (the default for weights that fit VMEM) and the
    # streaming-K path (forced, for coverage of the large-weight branch).
    fwd_resident = make_lnact(weight_t, bias, gamma, beta)
    fwd_stream = make_lnact(weight_t, bias, gamma, beta, force_streaming=True)

    for B in (8, 20):   # aligned rows, and a misaligned row count (padding path)
        x = jax.random.normal(jax.random.fold_in(kx, B), (B, in_channels),
                              jnp.float32)
        ref = reference_forward(x, weight_t, bias, gamma, beta)
        for fwd in (fwd_resident, fwd_stream):
            out = jax.block_until_ready(fwd(x))
            assert out.shape == (B, out_channels)
            assert jnp.allclose(out, ref, atol=1e-5, rtol=1e-5)

    # TODO(synk): the AttentionModule cond branch (use_cond=True) is computed
    # but discarded by the reference forward, so it is not implemented here.
    print("KERNEL_OK")
</pallas_src>

<mosaic_0001>
module attributes {stable_mosaic.version = 11 : i64} {
  func.func @lnact_kernel_resident(%arg0: i32, %arg1: memref<8x128xf32, #tpu.memory_space<vmem>>, %arg2: memref<128x128xf32, #tpu.memory_space<vmem>>, %arg3: memref<3x128xf32, #tpu.memory_space<vmem>>, %arg4: memref<8x128xf32, #tpu.memory_space<vmem>>) attributes {dimension_semantics = [#tpu.dimension_semantics<parallel>], iteration_bounds = array<i64: 1>, scalar_prefetch = 0 : i64, scratch_operands = 0 : i64, tpu.core_type = #tpu.core_type<tc>, window_params = [{transform_indices = @transform_0, window_bounds = array<i64: 8, 128>}, {pipeline_mode = #tpu.pipeline_mode<synchronous>, transform_indices = @transform_1, window_bounds = array<i64: 128, 128>}, {pipeline_mode = #tpu.pipeline_mode<synchronous>, transform_indices = @transform_2, window_bounds = array<i64: 3, 128>}, {transform_indices = @transform_3, window_bounds = array<i64: 8, 128>}]} {
    %c0 = arith.constant 0 : index
    %c0_0 = arith.constant 0 : index
    %0 = vector.load %arg1[%c0, %c0_0] : memref<8x128xf32, #tpu.memory_space<vmem>>, vector<8x128xf32>
    %c0_1 = arith.constant 0 : index
    %c0_2 = arith.constant 0 : index
    %1 = vector.load %arg2[%c0_1, %c0_2] : memref<128x128xf32, #tpu.memory_space<vmem>>, vector<128x128xf32>
    %cst = arith.constant dense<0.000000e+00> : vector<8x128xf32>
    %2 = tpu.matmul %0, %1, %cst {dimension_numbers = #tpu.dot_dimension_numbers<[1], [0], [0], [1], [0, 0, 1, 1], [], []>} : vector<8x128xf32>, vector<128x128xf32>, vector<8x128xf32> -> vector<8x128xf32>
    %c0_3 = arith.constant 0 : index
    %c0_4 = arith.constant 0 : index
    %3 = vector.load %arg3[%c0_3, %c0_4] : memref<3x128xf32, #tpu.memory_space<vmem>>, vector<3x128xf32>
    %4 = vector.extract_strided_slice %3 {offsets = [0, 0], sizes = [1, 128], strides = [1, 1]} : vector<3x128xf32> to vector<1x128xf32>
    %5 = vector.extract_strided_slice %3 {offsets = [1, 0], sizes = [1, 128], strides = [1, 1]} : vector<3x128xf32> to vector<1x128xf32>
    %6 = vector.extract_strided_slice %3 {offsets = [2, 0], sizes = [1, 128], strides = [1, 1]} : vector<3x128xf32> to vector<1x128xf32>
    %7 = vector.broadcast %4 : vector<1x128xf32> to vector<8x128xf32>
    %8 = arith.addf %2, %7 : vector<8x128xf32>
    %cst_5 = arith.constant dense<0.000000e+00> : vector<8xf32>
    %9 = vector.multi_reduction <add>, %8, %cst_5 [1] : vector<8x128xf32> to vector<8xf32>
    %10 = vector.shape_cast %9 : vector<8xf32> to vector<8x1xf32>
    %cst_6 = arith.constant 1.562500e-02 : f32
    %11 = vector.broadcast %cst_6 : f32 to vector<8x1xf32>
    %12 = arith.mulf %10, %11 : vector<8x1xf32>
    %13 = arith.mulf %8, %8 : vector<8x128xf32>
    %cst_7 = arith.constant dense<0.000000e+00> : vector<8xf32>
    %14 = vector.multi_reduction <add>, %13, %cst_7 [1] : vector<8x128xf32> to vector<8xf32>
    %15 = vector.shape_cast %14 : vector<8xf32> to vector<8x1xf32>
    %cst_8 = arith.constant 1.562500e-02 : f32
    %16 = vector.broadcast %cst_8 : f32 to vector<8x1xf32>
    %17 = arith.mulf %15, %16 : vector<8x1xf32>
    %18 = arith.mulf %12, %12 : vector<8x1xf32>
    %19 = arith.subf %17, %18 : vector<8x1xf32>
    %20 = vector.broadcast %12 : vector<8x1xf32> to vector<8x128xf32>
    %21 = arith.subf %8, %20 : vector<8x128xf32>
    %cst_9 = arith.constant 9.99999974E-6 : f32
    %22 = vector.broadcast %cst_9 : f32 to vector<8x1xf32>
    %23 = arith.addf %19, %22 : vector<8x1xf32>
    %24 = math.rsqrt %23 : vector<8x1xf32>
    %25 = vector.broadcast %24 : vector<8x1xf32> to vector<8x128xf32>
    %26 = arith.mulf %21, %25 : vector<8x128xf32>
    %27 = vector.broadcast %5 : vector<1x128xf32> to vector<8x128xf32>
    %28 = arith.mulf %26, %27 : vector<8x128xf32>
    %29 = vector.broadcast %6 : vector<1x128xf32> to vector<8x128xf32>
    %30 = arith.addf %28, %29 : vector<8x128xf32>
    %31 = arith.negf %30 : vector<8x128xf32>
    %32 = math.exp %31 : vector<8x128xf32>
    %cst_10 = arith.constant 1.000000e+00 : f32
    %33 = vector.broadcast %cst_10 : f32 to vector<8x128xf32>
    %34 = arith.addf %33, %32 : vector<8x128xf32>
    %35 = arith.divf %33, %34 : vector<8x128xf32>
    %36 = arith.mulf %30, %35 : vector<8x128xf32>
    %c0_11 = arith.constant 0 : index
    %c0_12 = arith.constant 0 : index
    %37 = vector.load %arg4[%c0_11, %c0_12] : memref<8x128xf32, #tpu.memory_space<vmem>>, vector<8x128xf32>
    tpu.vector_store %arg4[%c0_11, %c0_12], %36 {strides = array<i32>} : memref<8x128xf32, #tpu.memory_space<vmem>>, vector<8x128xf32>,
    return
  }
  func.func @transform_0(%arg0: i32) -> (i32, i32) {
    %c0_i32 = arith.constant 0 : i32
    %c0_i32_0 = arith.constant 0 : i32
    return %arg0, %c0_i32 : i32, i32
  }
  func.func @transform_1(%arg0: i32) -> (i32, i32) {
    %c0_i32 = arith.constant 0 : i32
    %c0_i32_0 = arith.constant 0 : i32
    %c0_i32_1 = arith.constant 0 : i32
    return %c0_i32, %c0_i32_0 : i32, i32
  }
  func.func @transform_2(%arg0: i32) -> (i32, i32) {
    %c0_i32 = arith.constant 0 : i32
    %c0_i32_0 = arith.constant 0 : i32
    %c0_i32_1 = arith.constant 0 : i32
    return %c0_i32, %c0_i32_0 : i32, i32
  }
  func.func @transform_3(%arg0: i32) -> (i32, i32) {
    %c0_i32 = arith.constant 0 : i32
    %c0_i32_0 = arith.constant 0 : i32
    return %arg0, %c0_i32 : i32, i32
  }
}

</mosaic_0001>

<bundles_post_ra>
// kernel: tpu_custom_call.1
= control target key start
LH: loop header
LB: loop body
LE: loop exit
PB: predicated region body
PF: predicated region fallthrough
CT: control target
= control target key end

     0   :  { %8 = vsyncpa [#allocation3], 0  ;;  %s384_s0 = inlined_call_operand.hbm [shape: f32[8,128], index: 0, kind: input, shape index: {}]   ;;  %s385_s1 = inlined_call_operand.hbm [shape: f32[128,128], index: 1, kind: input, shape index: {}]   ;;  %s386_s2 = inlined_call_operand.hbm [shape: f32[3,128], index: 2, kind: input, shape index: {}]   ;;  %s387_s3 = inlined_call_operand.hbm [shape: f32[8,128], index: 3, kind: output, shape index: {}]  }
   0x1   :  { %9 = vsyncpa [#allocation6], 0 }
   0x2   :  { %10 = vsyncpa [#allocation4], 0  ;;  %s344_s12 = smov [#allocation5]  }
   0x3   :  { %s26_s13 = sshll.u32 %s344_s12, 4  ;;  %s27_s13 = int_to_ptr.vmem [resolvable:$true] %s26_s13 }
   0x4   :  { %s266_s14 = scalar_lea.vmem %s27_s13, 2048  ;;  %p271_p1 = scmp.lt.s32.totalorder %s27_s13, %s27_s13 }
   0x5   :  { %p267_p0 = scmp.ne.s32.totalorder %s27_s13, %s266_s14  ;;  %p272_p2 = scmp.lt.s32.totalorder %s266_s14, %s266_s14 }
   0x7   :  { %p273_p3 = por %p272_p2, %p271_p1 }
   0x9   :  { %p274_p4 = pnand %p273_p3, %p267_p0 }
   0xb   :  { %277 = shalt.err (!%p274_p4)
}
   0xc   :  { %s345_s15 = smov 128   ;;  %s346_s16 = smov 8  }
   0xd   :  { %32 = dma.hbm_to_vmem [thread:$0]  %s385_s1, 2048, %s27_s13, [#allocation6], %s345_s15, %s345_s15, %s346_s16  }
   0xe   :  { %s347_s19 = smov [#allocation2]   ;;  %s348_s21 = smov [#allocation7]  }
   0xf   :  { %s17_s20 = sshll.u32 %s347_s19, 4  ;;  %s39_s22 = sshll.u32 %s348_s21, 4  ;;  %s18_s20 = int_to_ptr.vmem [resolvable:$true] %s17_s20  ;;  %s40_s22 = int_to_ptr.vmem [resolvable:$true] %s39_s22 }
  0x10   :  { %s286_s23 = scalar_lea.vmem %s18_s20, 128  ;;  %p291_p6 = scmp.lt.s32.totalorder %s18_s20, %s18_s20 }
  0x11   :  { %p287_p5 = scmp.ne.s32.totalorder %s18_s20, %s286_s23  ;;  %p292_p7 = scmp.lt.s32.totalorder %s286_s23, %s286_s23 }
  0x13   :  { %p293_p8 = por %p292_p7, %p291_p6 }
  0x15   :  { %p294_p9 = pnand %p293_p8, %p287_p5 }
  0x17   :  { %297 = shalt.err (!%p294_p9)
}
  0x18   :  { %20 = dma.hbm_to_vmem [thread:$0]  %s384_s0, 128, %s18_s20, [#allocation3]  }
  0x19   :  { %s306_s26 = scalar_lea.vmem %s40_s22, 64  ;;  %p311_p11 = scmp.lt.s32.totalorder %s40_s22, %s40_s22 }
  0x1a   :  { %p307_p10 = scmp.ne.s32.totalorder %s40_s22, %s306_s26  ;;  %p312_p12 = scmp.lt.s32.totalorder %s306_s26, %s306_s26 }
  0x1c   :  { %p313_p13 = por %p312_p12, %p311_p11 }
  0x1e   :  { %p314_p0 = pnand %p313_p13, %p307_p10 }
  0x20   :  { %317 = shalt.err (!%p314_p0)
}
  0x21   :  { %42 = dma.hbm_to_vmem [thread:$0]  %s386_s2, 64, %s40_s22, [#allocation6]  }
  0x22   :  { %338 = dma.done.wait [#allocation3], 128  }
  0x23   :  { %339 = vsyncadd [#allocation3], 4294967168 }
  0x24   :  { %340 = dma.done.wait [#allocation6], 2112  }
  0x25   :  { %341 = vsyncadd [#allocation6], 4294965184  ;;  %v349_v0 = vmov 0.0   ;;  %vm350_vm0 = vmmov 0   ;;  %v68_v1 = vld [vmem:[#allocation5 + $0x78] sm:$0xff]  ;;  %v67_v2 = vld [vmem:[#allocation5 + $0x70] sm:$0xff]  ;;  %v70_v18 = vlaneseq }
  0x26   :  { %209 = vmatprep.subr.mxu0 %v349_v0  ;;  %241 = vmatprep.mubr.msk.f32.mxu0 %vm350_vm0, %v349_v0  ;;  %v66_v3 = vld [vmem:[#allocation5 + $0x68] sm:$0xff]  ;;  %v65_v4 = vld [vmem:[#allocation5 + $0x60] sm:$0xff]  ;;  %v64_v5 = vld [vmem:[#allocation5 + $0x58] sm:$0xff]  ;;  %s351_s0 = smov [#allocation8]  }
  0x27   :  { %210 = vmatpush3.msra.mxu0 %v68_v1  ;;  %v63_v6 = vld [vmem:[#allocation5 + $0x50] sm:$0xff]  ;;  %v62_v7 = vld [vmem:[#allocation5 + $0x48] sm:$0xff]  ;;  %v61_v8 = vld [vmem:[#allocation5 + $0x40] sm:$0xff]  ;;  %v71_v19 = vshrl.u32 %v70_v18, 7  ;;  %s181_s2 = sshll.u32 %s351_s0, 4  ;;  %s182_s2 = int_to_ptr.vmem [resolvable:$true] %s181_s2 }
  0x28   :  { %211 = vmatprep.subr.mxu0 %v349_v0  ;;  %v60_v9 = vld [vmem:[#allocation5 + $0x38] sm:$0xff]  ;;  %v59_v10 = vld [vmem:[#allocation5 + $0x30] sm:$0xff]  ;;  %v58_v11 = vld [vmem:[#allocation5 + $0x28] sm:$0xff]  ;;  %s318_s28 = scalar_lea.vmem %s182_s2, 128  ;;  %p323_p2 = scmp.lt.s32.totalorder %s182_s2, %s182_s2 }
  0x29   :  { %212 = vmatpush3.msra.mxu0 %v67_v2  ;;  %v57_v12 = vld [vmem:[#allocation5 + $0x20] sm:$0xff]  ;;  %v56_v13 = vld [vmem:[#allocation5 + $0x18] sm:$0xff]  ;;  %v55_v14 = vld [vmem:[#allocation5 + $0x10] sm:$0xff]  ;;  %v72_v20 = vsub.s32 0, %v71_v19  ;;  %v159_v34 = vsub.s32 1, %v71_v19  ;;  %v164_v35 = vsub.s32 2, %v71_v19  ;;  %p319_p1 = scmp.ne.s32.totalorder %s182_s2, %s318_s28  ;;  %p324_p3 = scmp.lt.s32.totalorder %s318_s28, %s318_s28 }
  0x2a   :  { %213 = vmatprep.subr.mxu0 %v349_v0  ;;  %v54_v15 = vld [vmem:[#allocation5 + $0x8] sm:$0xff]  ;;  %v53_v16 = vld [vmem:[#allocation5] sm:$0xff]  ;;  %v52_v17 = vld [vmem:[#allocation2] sm:$0xff] }
  0x2b   :  { %214 = vmatpush3.msra.mxu0 %v66_v3  ;;  %v69_v21 = vld [vmem:[#allocation7] sm:$0x7]  ;;  %p325_p4 = por %p324_p3, %p323_p2 }
  0x2c   :  { %215 = vmatprep.subr.mxu0 %v349_v0  ;;  %v73_v22 = vrot.slane %v69_v21, %v72_v20  ;;  %v160_v36 = vrot.slane %v69_v21, %v159_v34  ;;  %v165_v39 = vrot.slane %v69_v21, %v164_v35 }
  0x2d   :  { %216 = vmatpush3.msra.mxu0 %v65_v4  ;;  %p326_p5 = pnand %p325_p4, %p319_p1 }
  0x2e   :  { %217 = vmatprep.subr.mxu0 %v349_v0 }
  0x2f   :  { %218 = vmatpush3.msra.mxu0 %v64_v5 }
  0x30   :  { %219 = vmatprep.subr.mxu0 %v349_v0 }
  0x31   :  { %220 = vmatpush3.msra.mxu0 %v63_v6 }
  0x32   :  { %221 = vmatprep.subr.mxu0 %v349_v0 }
  0x33   :  { %222 = vmatpush3.msra.mxu0 %v62_v7 }
  0x34   :  { %223 = vmatprep.subr.mxu0 %v349_v0 }
  0x35   :  { %224 = vmatpush3.msra.mxu0 %v61_v8 }
  0x36   :  { %225 = vmatprep.subr.mxu0 %v349_v0 }
  0x37   :  { %226 = vmatpush3.msra.mxu0 %v60_v9 }
  0x38   :  { %227 = vmatprep.subr.mxu0 %v349_v0 }
  0x39   :  { %228 = vmatpush3.msra.mxu0 %v59_v10 }
  0x3a   :  { %229 = vmatprep.subr.mxu0 %v349_v0 }
  0x3b   :  { %230 = vmatpush3.msra.mxu0 %v58_v11 }
  0x3c   :  { %231 = vmatprep.subr.mxu0 %v349_v0 }
  0x3d   :  { %232 = vmatpush3.msra.mxu0 %v57_v12 }
  0x3e   :  { %233 = vmatprep.subr.mxu0 %v349_v0 }
  0x3f   :  { %234 = vmatpush3.msra.mxu0 %v56_v13 }
  0x40   :  { %235 = vmatprep.subr.mxu0 %v349_v0 }
  0x41   :  { %236 = vmatpush3.msra.mxu0 %v55_v14 }
  0x42   :  { %237 = vmatprep.subr.mxu0 %v349_v0 }
  0x43   :  { %238 = vmatpush3.msra.mxu0 %v54_v15 }
  0x44   :  { %239 = vmatprep.subr.mxu0 %v349_v0 }
  0x45   :  { %240 = vmatpush3.msra.mxu0 %v53_v16 }
  0x46   :  { %242 = vmatmul.mubr.f32.vlgmr.msra.gmra.mxu0 %v52_v17 }
 0x106   :  { %v140_v23 = vpop.f32.mrf.mxu0 }
 0x107   :  { %v141_v24 = vadd.f32 %v140_v23, %v73_v22 }
 0x108   :  { %v243_v25 = vpop.f32.mrf.mxu0 }
 0x109   :  { %144 = vadd.xlane.f32.xlu0 %v141_v24  ;;  %v147_v26 = vmul.f32 %v141_v24, %v141_v24 }
 0x10d   :  { %148 = vadd.xlane.f32.xlu0 %v147_v26 }
 0x192   :  { %v145_v27 = vpop.xlane.xlu0 %144 }
 0x193   :  { %v146_v28 = vmul.f32 0.015625, %v145_v27 }
 0x195   :  { %v151_v30 = vmul.f32 %v146_v28, %v146_v28  ;;  %v153_v37 = vsub.f32 %v141_v24, %v146_v28 }
 0x196   :  { %v149_v29 = vpop.xlane.xlu0 %148 }
 0x197   :  { %v150_v31 = vmul.f32 0.015625, %v149_v29 }
 0x199   :  { %v152_v32 = vsub.f32 %v150_v31, %v151_v30 }
 0x19b   :  { %v154_v33 = vadd.f32 1e-05, %v152_v32 }
 0x19d   :  { %252 = vrsqrt.f32 %v154_v33 }
 0x1aa   :  { %v253_v38 = vpop.eup %252 }
 0x1ab   :  { %v156_v40 = vmul.f32 %v253_v38, %v153_v37 }
 0x1ad   :  { %v161_v41 = vmul.f32 %v160_v36, %v156_v40 }
 0x1af   :  { %v166_v42 = vadd.f32 %v165_v39, %v161_v41 }
 0x1b1   :  { %v191_v43 = vmul.f32 -1.442695, %v166_v42 }
 0x1b3   :  { %254 = vpow2.f32 %v191_v43 }
 0x1c0   :  { %v255_v44 = vpop.eup %254 }
 0x1c1   :  { %v170_v45 = vadd.f32 1.0, %v255_v44 }
 0x1c3   :  { %256 = vrcp.f32 %v170_v45 }
 0x1d0   :  { %v257_v46 = vpop.eup %256 }
 0x1d1   :  { %v173_v47 = vmul.f32 %v257_v46, %v166_v42 }
 0x1d3   :  { %174 = vst [vmem:[#allocation8] sm:$0xff] %v173_v47 }
 0x1d4   :  { %329 = shalt.err (!%p326_p5)
}
 0x1d5   :  { %184 = dma.vmem_to_hbm [thread:$0]  %s182_s2, 128, %s387_s3, [#allocation4]  }
 0x1d6   :  { %342 = dma.done.wait [#allocation4], 128  }
 0x1d7   :  { %343 = vsyncadd [#allocation4], 4294967168 }
 0x1d8   :  { %188 = vsyncpa [#allocation3], 1 }
 0x1d9   :  { %189 = vsyncpa [#allocation6], 1 }
 0x1da   :  { %190 = vsyncpa [#allocation4], 1 }

</bundles_post_ra>
